<compile_context>
chip_gen: v7x
topology: tpu7x:2x2x1
jax: 0.10.0
libtpu: 0.0.40
codegen_flags: <defaults>
</compile_context>

<pallas_src>
import jax
import jax.numpy as jnp
import numpy as np
from jax import lax
from jax.experimental import pallas as pl
from jax.experimental.pallas import tpu as pltpu


def _round_up(x, m):
    return ((x + m - 1) // m) * m


# ---------------------------------------------------------------------------------------
# Kernel 1: time-parallel projection of x (all x-only matmuls hoisted out of the loop).
# ---------------------------------------------------------------------------------------
def gcru_xproj_kernel(x_ref, a_ref, w4_ref, b4_ref, xterm_ref):
    # x_ref     : [Tt, N, Fp]   bf16
    # a_ref     : [N, N]        bf16   row-normalized mean-aggregation matrix
    # w4_ref    : [Fp, 4*Hp]    bf16   = [Wxr | Wxz | Wr_x | Wl_x]
    # b4_ref    : [1, 4*Hp]     f32    = [bxr | bxz | bl | 0]
    # xterm_ref : [Tt, N, 3*Hp] f32    = [x-term of r | x-term of z | x-term of n]
    Tt, N, Fp = x_ref.shape
    Hp = w4_ref.shape[1] // 4

    xc = x_ref[...]                                                  # [Tt, N, Fp] bf16
    proj = jnp.dot(xc.reshape(Tt * N, Fp), w4_ref[...],
                   preferred_element_type=jnp.float32) + b4_ref[...]
    proj = proj.reshape(Tt, N, 4 * Hp)                               # f32

    # Neighbor mean of (x @ Wl_x):  (A @ x) @ Wl_x == A @ (x @ Wl_x)
    xwl = proj[..., 3 * Hp:].astype(jnp.bfloat16)                    # [Tt, N, Hp]
    a_b = jnp.broadcast_to(a_ref[...], (Tt, N, N))                   # bf16
    agg = jnp.einsum("tij,tjh->tih", a_b, xwl,
                     preferred_element_type=jnp.float32)             # [Tt, N, Hp] f32

    xterm_ref[...] = jnp.concatenate(
        [proj[..., : 2 * Hp], proj[..., 2 * Hp: 3 * Hp] + agg], axis=-1)


# ---------------------------------------------------------------------------------------
# Kernel 2: the serial recurrence (only h-dependent matmuls remain, fused).
# ---------------------------------------------------------------------------------------
def gcru_recurrent_kernel(xterm_ref, h0_ref, a_ref, whrz_ref, wn_ref, out_ref, ht_ref):
    # xterm_ref : [Tt, N, 3*Hp] f32   precomputed x-terms for this (batch, chunk)
    # h0_ref    : [N, Hp]       f32   initial hidden state for this batch element
    # a_ref     : [N, N]        bf16
    # whrz_ref  : [Hp, 2*Hp]    bf16  = [Whr | Whz]
    # wn_ref    : [2*Hp, Hp]    bf16  = [[Wr_h], [Wl_h]]
    # out_ref   : [Tt, N, Hp]   f32   per-step hidden states
    # ht_ref    : [N, Hp]       f32   resident hidden-state carrier / final h_T
    c = pl.program_id(1)

    @pl.when(c == 0)
    def _():
        ht_ref[...] = h0_ref[...]

    Tt = xterm_ref.shape[0]
    Hp = ht_ref.shape[-1]

    a = a_ref[...]
    whrz = whrz_ref[...]
    wn = wn_ref[...]

    def step(i, h):                                                  # h: [N, Hp] f32
        xt = xterm_ref[i]                                            # [N, 3*Hp] f32
        h_bf = h.astype(jnp.bfloat16)
        g = xt[:, : 2 * Hp] + jnp.dot(h_bf, whrz,
                                      preferred_element_type=jnp.float32)
        r = jax.nn.sigmoid(g[:, :Hp])                                # f32 elementwise
        z = jax.nn.sigmoid(g[:, Hp:])
        rh = (r * h).astype(jnp.bfloat16)                            # [N, Hp] bf16
        agg_h = jnp.dot(a, rh, preferred_element_type=jnp.float32)   # A @ (r*h)
        nin = jnp.concatenate([rh, agg_h.astype(jnp.bfloat16)], axis=-1)   # [N, 2Hp]
        n = xt[:, 2 * Hp:] + jnp.dot(nin, wn,
                                     preferred_element_type=jnp.float32)
        h_new = (1.0 - z) * n + z * h                                # f32 blend
        out_ref[i] = h_new
        return h_new

    h_final = lax.fori_loop(0, Tt, step, ht_ref[...], unroll=True)
    ht_ref[...] = h_final


# ---------------------------------------------------------------------------------------
# Wrapper: layout / padding / weight fusion glue + the two pallas_calls.
# ---------------------------------------------------------------------------------------
def gcru_forward(x, edge_index, params, h_prev=None, time_chunk=None):
    """x: [B, N, T, F] f32, edge_index: [1, 2, E] int32.

    Returns (outputs [B, N, T, H], h_T [B, N, H]) matching the PyTorch GCRU module.
    """
    B, N, T, F = x.shape
    H = params["whr"].shape[0]
    Hp = _round_up(H, 128)
    Fp = _round_up(F, 128)
    Tt = T if time_chunk is None else time_chunk
    assert T % Tt == 0, "time_chunk must divide T"
    C = T // Tt

    f32, bf16 = jnp.float32, jnp.bfloat16

    # --- glue: dense mean-aggregation matrix from edge_index[0] (scatter-add) ---
    ei = edge_index[0]
    src, dst = ei[0], ei[1]
    A = jnp.zeros((N, N), f32).at[dst, src].add(1.0)
    deg = A.sum(axis=1, keepdims=True)
    A = jnp.where(deg > 0, A / jnp.maximum(deg, 1.0), 0.0)
    a_bf = A.astype(bf16)

    # --- glue: zero-padded, fused weights (lane dims -> multiples of 128, bf16) ---
    def pad2(w, rows, cols):
        return jnp.zeros((rows, cols), f32).at[: w.shape[0], : w.shape[1]].set(w)

    w4 = jnp.concatenate(
        [pad2(params["wxr"], Fp, Hp), pad2(params["wxz"], Fp, Hp),
         pad2(params["wr_x"], Fp, Hp), pad2(params["wl_x"], Fp, Hp)],
        axis=1).astype(bf16)                                           # [Fp, 4Hp]
    b4 = jnp.concatenate(
        [pad2(params["bxr"], 1, Hp), pad2(params["bxz"], 1, Hp),
         pad2(params["bl"], 1, Hp), jnp.zeros((1, Hp), f32)], axis=1)  # [1, 4Hp] f32
    whrz = jnp.concatenate(
        [pad2(params["whr"], Hp, Hp), pad2(params["whz"], Hp, Hp)],
        axis=1).astype(bf16)                                           # [Hp, 2Hp]
    wn = jnp.concatenate(
        [pad2(params["wr_h"], Hp, Hp), pad2(params["wl_h"], Hp, Hp)],
        axis=0).astype(bf16)                                           # [2Hp, Hp]

    # --- glue: layouts ---
    x_k = jnp.transpose(x, (0, 2, 1, 3))                               # [B, T, N, F]
    x_k = jnp.pad(x_k, ((0, 0), (0, 0), (0, 0), (0, Fp - F))).astype(bf16)

    if h_prev is None:
        h0 = jnp.zeros((B, N, Hp), f32)
    else:
        h0 = jnp.zeros((B, N, Hp), f32).at[:, :, :H].set(
            jnp.broadcast_to(h_prev, (B, N, H)).astype(f32))

    vmem_limit = 64 * 1024 * 1024   # also fits v7x's 64 MiB physical VMEM

    # --- kernel 1: x-only terms for all timesteps (fully parallel grid) ---
    xterm = pl.pallas_call(
        gcru_xproj_kernel,
        out_shape=jax.ShapeDtypeStruct((B, T, N, 3 * Hp), f32),
        grid_spec=pltpu.PrefetchScalarGridSpec(
            num_scalar_prefetch=0,
            grid=(B, C),
            in_specs=[
                pl.BlockSpec((None, Tt, N, Fp), lambda b, c: (b, c, 0, 0)),
                pl.BlockSpec((N, N), lambda b, c: (0, 0)),
                pl.BlockSpec((Fp, 4 * Hp), lambda b, c: (0, 0)),
                pl.BlockSpec((1, 4 * Hp), lambda b, c: (0, 0)),
            ],
            out_specs=pl.BlockSpec((None, Tt, N, 3 * Hp), lambda b, c: (b, c, 0, 0)),
        ),
        compiler_params=pltpu.CompilerParams(
            dimension_semantics=("parallel", "parallel"),
            vmem_limit_bytes=vmem_limit),
    )(x_k, a_bf, w4, b4)

    # --- kernel 2: the recurrence (batch parallel for megacore, time serial) ---
    out_pad, ht_pad = pl.pallas_call(
        gcru_recurrent_kernel,
        out_shape=(jax.ShapeDtypeStruct((B, T, N, Hp), f32),
                   jax.ShapeDtypeStruct((B, N, Hp), f32)),
        grid_spec=pltpu.PrefetchScalarGridSpec(
            num_scalar_prefetch=0,
            grid=(B, C),
            in_specs=[
                pl.BlockSpec((None, Tt, N, 3 * Hp), lambda b, c: (b, c, 0, 0)),  # xterm
                pl.BlockSpec((None, N, Hp), lambda b, c: (b, 0, 0)),             # h0
                pl.BlockSpec((N, N), lambda b, c: (0, 0)),                       # A
                pl.BlockSpec((Hp, 2 * Hp), lambda b, c: (0, 0)),                 # [Whr|Whz]
                pl.BlockSpec((2 * Hp, Hp), lambda b, c: (0, 0)),                 # [[Wr_h],[Wl_h]]
            ],
            out_specs=[
                pl.BlockSpec((None, Tt, N, Hp), lambda b, c: (b, c, 0, 0)),      # per-step h
                pl.BlockSpec((None, N, Hp), lambda b, c: (b, 0, 0)),             # resident h_T
            ],
        ),
        compiler_params=pltpu.CompilerParams(
            dimension_semantics=("parallel", "arbitrary"),
            vmem_limit_bytes=vmem_limit),
    )(xterm, h0, a_bf, whrz, wn)

    outputs = jnp.transpose(out_pad[..., :H], (0, 2, 1, 3))            # [B, N, T, H]
    h_T = ht_pad[..., :H]                                              # [B, N, H]
    return outputs, h_T


# ---------------------------------------------------------------------------------------
# Pure-JAX f32 reference mirroring the PyTorch module semantics.
# ---------------------------------------------------------------------------------------
def gcru_reference(x, edge_index, params, h_prev=None):
    B, N, T, F = x.shape
    H = params["whr"].shape[0]
    ei = edge_index[0]
    src, dst = ei[0], ei[1]
    A = jnp.zeros((N, N), jnp.float32).at[dst, src].add(1.0)
    deg = A.sum(axis=1, keepdims=True)
    A = jnp.where(deg > 0, A / jnp.maximum(deg, 1.0), 0.0)

    h = jnp.zeros((N, H), jnp.float32) if h_prev is None else h_prev
    outs = []
    for t in range(T):
        xt = x[:, :, t]                                                # [B, N, F]
        r = jax.nn.sigmoid(xt @ params["wxr"] + params["bxr"] + h @ params["whr"])
        z = jax.nn.sigmoid(xt @ params["wxz"] + params["bxz"] + h @ params["whz"])
        rh = r * h                                                     # [B, N, H]
        agg_x = jnp.einsum("ij,bjf->bif", A, xt)
        agg_h = jnp.einsum("ij,bjh->bih", A, rh)
        n = (agg_x @ params["wl_x"] + agg_h @ params["wl_h"] + params["bl"]
             + xt @ params["wr_x"] + rh @ params["wr_h"])
        h = (1.0 - z) * n + z * h
        outs.append(h)
    return jnp.stack(outs, axis=2), h


def make_params(key, F, H):
    ks = jax.random.split(key, 11)
    s = 0.1
    return {
        "wxr": s * jax.random.normal(ks[0], (F, H), jnp.float32),
        "bxr": s * jax.random.normal(ks[1], (1, H), jnp.float32),
        "whr": s * jax.random.normal(ks[2], (H, H), jnp.float32),
        "wxz": s * jax.random.normal(ks[3], (F, H), jnp.float32),
        "bxz": s * jax.random.normal(ks[4], (1, H), jnp.float32),
        "whz": s * jax.random.normal(ks[5], (H, H), jnp.float32),
        "wl_x": s * jax.random.normal(ks[6], (F, H), jnp.float32),
        "wl_h": s * jax.random.normal(ks[7], (H, H), jnp.float32),
        "bl": s * jax.random.normal(ks[8], (1, H), jnp.float32),
        "wr_x": s * jax.random.normal(ks[9], (F, H), jnp.float32),
        "wr_h": s * jax.random.normal(ks[10], (H, H), jnp.float32),
    }


if __name__ == "__main__":
    B, N, T, F, H = 2, 16, 8, 8, 32

    key = jax.random.PRNGKey(0)
    kx, kp = jax.random.split(key, 2)

    x = jax.random.normal(kx, (B, N, T, F), jnp.float32)
    params = make_params(kp, F, H)

    # Deterministic small graph: ring plus a few chords.  edge_index shape [1, 2, E]
    # (the PyTorch module indexes edge_index[0] before use).
    src = np.concatenate([np.arange(N), np.array([0, 3, 7, 11])])
    dst = np.concatenate([(np.arange(N) + 1) % N, np.array([8, 12, 2, 5])])
    edge_index = jnp.asarray(np.stack([src, dst])[None, :, :], dtype=jnp.int32)

    out, h_T = gcru_forward(x, edge_index, params)
    out = jax.block_until_ready(out)
    h_T = jax.block_until_ready(h_T)

    out_ref, h_ref = gcru_reference(x, edge_index, params)
    assert out.shape == (B, N, T, H) and h_T.shape == (B, N, H)
    # bf16 MXU operands with f32 accumulation -> relaxed tolerance vs the f32 reference.
    np.testing.assert_allclose(np.asarray(out), np.asarray(out_ref), rtol=2e-2, atol=2e-2)
    np.testing.assert_allclose(np.asarray(h_T), np.asarray(h_ref), rtol=2e-2, atol=2e-2)

    print("KERNEL_OK")
</pallas_src>

<mosaic_0001>
module attributes {stable_mosaic.version = 11 : i64} {
  func.func @gcru_xproj_kernel(%arg0: i32, %arg1: i32, %arg2: memref<1x8x16x128xbf16, #tpu.memory_space<vmem>>, %arg3: memref<16x16xbf16, #tpu.memory_space<vmem>>, %arg4: memref<128x512xbf16, #tpu.memory_space<vmem>>, %arg5: memref<1x512xf32, #tpu.memory_space<vmem>>, %arg6: memref<1x8x16x384xf32, #tpu.memory_space<vmem>>) attributes {dimension_semantics = [#tpu.dimension_semantics<parallel>, #tpu.dimension_semantics<parallel>], iteration_bounds = array<i64: 2, 1>, scalar_prefetch = 0 : i64, scratch_operands = 0 : i64, tpu.core_type = #tpu.core_type<tc>, window_params = [{transform_indices = @transform_0, window_bounds = array<i64: 1, 8, 16, 128>}, {pipeline_mode = #tpu.pipeline_mode<synchronous>, transform_indices = @transform_1, window_bounds = array<i64: 16, 16>}, {pipeline_mode = #tpu.pipeline_mode<synchronous>, transform_indices = @transform_2, window_bounds = array<i64: 128, 512>}, {pipeline_mode = #tpu.pipeline_mode<synchronous>, transform_indices = @transform_3, window_bounds = array<i64: 1, 512>}, {transform_indices = @transform_4, window_bounds = array<i64: 1, 8, 16, 384>}]} {
    %c0 = arith.constant 0 : index
    %c0_0 = arith.constant 0 : index
    %c0_1 = arith.constant 0 : index
    %c0_2 = arith.constant 0 : index
    %0 = vector.load %arg2[%c0, %c0_0, %c0_1, %c0_2] : memref<1x8x16x128xbf16, #tpu.memory_space<vmem>>, vector<1x8x16x128xbf16>
    %1 = vector.shape_cast %0 : vector<1x8x16x128xbf16> to vector<8x16x128xbf16>
    %2 = vector.shape_cast %1 : vector<8x16x128xbf16> to vector<128x128xbf16>
    %c0_3 = arith.constant 0 : index
    %c0_4 = arith.constant 0 : index
    %3 = vector.load %arg4[%c0_3, %c0_4] : memref<128x512xbf16, #tpu.memory_space<vmem>>, vector<128x512xbf16>
    %cst = arith.constant dense<0.000000e+00> : vector<128x512xf32>
    %4 = tpu.matmul %2, %3, %cst {dimension_numbers = #tpu.dot_dimension_numbers<[1], [0], [0], [1], [0, 0, 1, 1], [], []>} : vector<128x128xbf16>, vector<128x512xbf16>, vector<128x512xf32> -> vector<128x512xf32>
    %c0_5 = arith.constant 0 : index
    %c0_6 = arith.constant 0 : index
    %5 = vector.load %arg5[%c0_5, %c0_6] : memref<1x512xf32, #tpu.memory_space<vmem>>, vector<1x512xf32>
    %6 = vector.broadcast %5 : vector<1x512xf32> to vector<128x512xf32>
    %7 = arith.addf %4, %6 : vector<128x512xf32>
    %8 = vector.shape_cast %7 : vector<128x512xf32> to vector<8x16x512xf32>
    %9 = vector.extract_strided_slice %8 {offsets = [0, 0, 384], sizes = [8, 16, 128], strides = [1, 1, 1]} : vector<8x16x512xf32> to vector<8x16x128xf32>
    %10 = arith.truncf %9 : vector<8x16x128xf32> to vector<8x16x128xbf16>
    %c0_7 = arith.constant 0 : index
    %c0_8 = arith.constant 0 : index
    %11 = vector.load %arg3[%c0_7, %c0_8] : memref<16x16xbf16, #tpu.memory_space<vmem>>, vector<16x16xbf16>
    %12 = vector.shape_cast %11 : vector<16x16xbf16> to vector<1x16x16xbf16>
    %13 = vector.broadcast %12 : vector<1x16x16xbf16> to vector<8x16x16xbf16>
    "tpu.trace_start"() <{level = 10 : i32, message = "tij,tjh->tih"}> : () -> ()
    %cst_9 = arith.constant dense<0.000000e+00> : vector<8x16x128xf32>
    %14 = tpu.matmul %13, %10, %cst_9 {dimension_numbers = #tpu.dot_dimension_numbers<[2], [1], [1], [2], [0, 0, 0, 1, 1, 2], [0], [0]>} : vector<8x16x16xbf16>, vector<8x16x128xbf16>, vector<8x16x128xf32> -> vector<8x16x128xf32>
    "tpu.trace_stop"() : () -> ()
    %15 = vector.extract_strided_slice %8 {offsets = [0, 0, 0], sizes = [8, 16, 256], strides = [1, 1, 1]} : vector<8x16x512xf32> to vector<8x16x256xf32>
    %16 = vector.extract_strided_slice %8 {offsets = [0, 0, 256], sizes = [8, 16, 128], strides = [1, 1, 1]} : vector<8x16x512xf32> to vector<8x16x128xf32>
    %17 = arith.addf %16, %14 : vector<8x16x128xf32>
    %18 = tpu.concatenate %15, %17 in 2 : vector<8x16x256xf32>, vector<8x16x128xf32> -> vector<8x16x384xf32>
    %c0_10 = arith.constant 0 : index
    %c0_11 = arith.constant 0 : index
    %c0_12 = arith.constant 0 : index
    %c0_13 = arith.constant 0 : index
    %19 = vector.load %arg6[%c0_10, %c0_11, %c0_12, %c0_13] : memref<1x8x16x384xf32, #tpu.memory_space<vmem>>, vector<1x8x16x384xf32>
    %20 = vector.shape_cast %19 : vector<1x8x16x384xf32> to vector<8x16x384xf32>
    %21 = vector.shape_cast %18 : vector<8x16x384xf32> to vector<1x8x16x384xf32>
    tpu.vector_store %arg6[%c0_10, %c0_11, %c0_12, %c0_13], %21 {strides = array<i32>} : memref<1x8x16x384xf32, #tpu.memory_space<vmem>>, vector<1x8x16x384xf32>,
    return
  }
  func.func @transform_0(%arg0: i32, %arg1: i32) -> (i32, i32, i32, i32) {
    %c0_i32 = arith.constant 0 : i32
    %c0_i32_0 = arith.constant 0 : i32
    %c0_i32_1 = arith.constant 0 : i32
    return %arg0, %arg1, %c0_i32, %c0_i32_0 : i32, i32, i32, i32
  }
  func.func @transform_1(%arg0: i32, %arg1: i32) -> (i32, i32) {
    %c0_i32 = arith.constant 0 : i32
    %c0_i32_0 = arith.constant 0 : i32
    %c0_i32_1 = arith.constant 0 : i32
    return %c0_i32, %c0_i32_0 : i32, i32
  }
  func.func @transform_2(%arg0: i32, %arg1: i32) -> (i32, i32) {
    %c0_i32 = arith.constant 0 : i32
    %c0_i32_0 = arith.constant 0 : i32
    %c0_i32_1 = arith.constant 0 : i32
    return %c0_i32, %c0_i32_0 : i32, i32
  }
  func.func @transform_3(%arg0: i32, %arg1: i32) -> (i32, i32) {
    %c0_i32 = arith.constant 0 : i32
    %c0_i32_0 = arith.constant 0 : i32
    %c0_i32_1 = arith.constant 0 : i32
    return %c0_i32, %c0_i32_0 : i32, i32
  }
  func.func @transform_4(%arg0: i32, %arg1: i32) -> (i32, i32, i32, i32) {
    %c0_i32 = arith.constant 0 : i32
    %c0_i32_0 = arith.constant 0 : i32
    %c0_i32_1 = arith.constant 0 : i32
    return %arg0, %arg1, %c0_i32, %c0_i32_0 : i32, i32, i32, i32
  }
}

</mosaic_0001>

<bundles_post_ra>
// kernel: tpu_custom_call.1
= control target key start
LH: loop header
LB: loop body
LE: loop exit
PB: predicated region body
PF: predicated region fallthrough
CT: control target
= control target key end

     0   :  { %s2405_s0 = inlined_call_operand.hbm [shape: bf16[2,8,16,128], index: 0, kind: input, shape index: {}]   ;;  %s2406_s1 = inlined_call_operand.hbm [shape: bf16[16,16], index: 1, kind: input, shape index: {}]   ;;  %s2407_s2 = inlined_call_operand.hbm [shape: bf16[128,512], index: 2, kind: input, shape index: {}]   ;;  %s2408_s3 = inlined_call_operand.hbm [shape: f32[1,512], index: 3, kind: input, shape index: {}]   ;;  %s2409_s4 = inlined_call_operand.hbm [shape: f32[2,8,16,384], index: 4, kind: output, shape index: {}]  }
   0x1   :  { %2416 = sst [smem:[#allocation15_spill]] %s2406_s1 }
   0x2   :  { %9 = vsyncpa [#allocation3], 0 }
   0x3   :  { %11 = vsyncpa [#allocation3 + $0x1], 0 }
   0x4   :  { %12 = vsyncpa [#allocation6], 0 }
   0x5   :  { %13 = vsyncpa [#allocation9], 0 }
   0x6   :  { %14 = vsyncpa [#allocation4], 0 }
   0x7   :  { %16 = vsyncpa [#allocation4 + $0x1], 0  ;;  %s1866_s15 = smov 0   ;;  %s1868_s16 = smov 0  }
   0x8   :  { %s1870_s17 = smov 0   ;;  %s1872_s18 = smov 0  }
   0x9   :  { %s1874_s19 = smov 0   ;;  %s1876_s20 = smov 0  }
   0xa LB: > { %s1328_s21 = sadd.s32 4294967295, %s1825_s20   ;;  %s1329_s22 = sadd.s32 4294967294, %s1825_s20   ;;  %s1825_s20 = sphi %s1876_s20, %s22_s20   ;;  %s1821_s19 = sphi %s1874_s19, %s2440_s19   ;;  %s1817_s18 = sphi %s1872_s18, %s2439_s18   ;;  %s1813_s17 = sphi %s1870_s17, %s2438_s17   ;;  %s1809_s16 = sphi %s1868_s16, %s2437_s16   ;;  %s1805_s15 = sphi %s1866_s15, %s2436_s15  }
   0xb   : > { %p56_p0 = scmp.ne.s32.totalorder %s1809_s16, %s1805_s15  ;;  %p1900_p1 = scmp.eq.s32.totalorder %s1328_s21, 0 }
   0xc   : > { %p1904_p2 = scmp.eq.s32.totalorder %s1328_s21, 1  ;;  %p151_p3 = scmp.eq.s32.totalorder %s1329_s22, 1 }
   0xd   : > { %s2417_s23 = scalar_select %p1900_p1, 1, 0 }
   0xe   : > { %s2418_s24 = scalar_select %p1904_p2, 1, 0 }
   0xf   : > { %p1910_p4 = por %p1900_p1, %p56_p0  ;;  %p1330_p5 = scmp.ge.s32.totalorder %s1825_s20, 1 }
  0x10   : > { %p1915_p6 = por %p151_p3, %p56_p0  ;;  %p158_p7 = scmp.lt.s32.totalorder %s1825_s20, 3 }
  0x11   : > { %s2419_s25 = scalar_select %p1910_p4, 1, 0 }
  0x12   : > { %s2420_s26 = scalar_select %p1915_p6, 1, 0 }
  0x13   : > { %p1920_p8 = pnand %p1330_p5, %p158_p7  ;;  %s1827_s28 = smov [#allocation5]  }
  0x14   : > { %s170_s29 = sshll.u32 %s1827_s28, 4  ;;  %s1828_s5 = smov [#allocation7]   ;;  %s1924_s29 = int_to_ptr.vmem [resolvable:$true] %s170_s29 }
  0x15   : > { %s2421_s27 = scalar_select %p1920_p8, 1, 0 }
  0x16   : > { %p1478_p9 = pneg %p1920_p8  ;;  %s183_s6 = sshll.u32 %s1828_s5, 4  ;;  %s1935_s6 = int_to_ptr.vmem [resolvable:$true] %s183_s6 }
  0x17   : > { %s2423_s1 = sld [smem:[#allocation15_spill]] }
  0x18   : > { %p1931_p11 = pnand %p1478_p9, %p1900_p1 }
  0x1a   : > { %p1945_p13 = pneg %p1931_p11 }
  0x1d   : > { %s1621_s9 = scalar_lea.hbm %s2423_s1, 128 }
  0x1e   : > { %p1622_p12 = scmp.ne.s32.totalorder %s2423_s1, %s1621_s9  ;;  %p1628_p5 = scmp.lt.u32.totalorder %s1621_s9, %s2423_s1 }
  0x20   : > { %p1624_p0 = pnand %p1945_p13, %p1622_p12 }
  0x22   : > { %p1625_p3 = pneg %p1624_p0 }
  0x24   : > { %p1630_p7 = pnand %p1628_p5, %p1625_p3 }
  0x26   : > { %1633 = shalt.err (!%p1630_p7)
}
  0x27   : > { %s1634_s21 = scalar_lea.vmem %s1924_s29, 128  ;;  %p1642_p1 = scmp.lt.s32.totalorder %s1924_s29, %s1924_s29 }
  0x28   : > { %p1635_p9 = scmp.ne.s32.totalorder %s1924_s29, %s1634_s21  ;;  %p1643_p4 = scmp.lt.s32.totalorder %s1634_s21, %s1634_s21 }
  0x2a   : > { %p1637_p10 = pnand %p1635_p9, %p1945_p13  ;;  %p1644_p12 = por %p1643_p4, %p1642_p1 }
  0x2c   : > { %p1638_p6 = pneg %p1637_p10 }
  0x2e   : > { %p1645_p0 = pnand %p1644_p12, %p1638_p6 }
  0x30   : > { %1648 = shalt.err (!%p1645_p0)
}
  0x31   : > { %s2413_s22 = smov 64   ;;  %s2414_s28 = smov 4  }
  0x32   : > { %1481 = dma.hbm_to_vmem [thread:$0]  (!%p1931_p11), %s2423_s1, 128, %s1924_s29, [#allocation6], %s2413_s22, %s2413_s22, %s2414_s28  }
  0x33   : > { %s1649_s10 = scalar_lea.hbm %s2407_s2, 4096 }
  0x34   : > { %p1650_p1 = scmp.ne.s32.totalorder %s2407_s2, %s1649_s10  ;;  %p1656_p10 = scmp.lt.u32.totalorder %s1649_s10, %s2407_s2 }
  0x36   : > { %p1652_p4 = pnand %p1650_p1, %p1945_p13 }
  0x38   : > { %p1653_p6 = pneg %p1652_p4 }
  0x3a   : > { %p1658_p3 = pnand %p1656_p10, %p1653_p6 }
  0x3c   : > { %1661 = shalt.err (!%p1658_p3)
}
  0x3d   : > { %s1662_s29 = scalar_lea.vmem %s1935_s6, 4096  ;;  %p1670_p12 = scmp.lt.s32.totalorder %s1935_s6, %s1935_s6 }
  0x3e   : > { %p1663_p5 = scmp.ne.s32.totalorder %s1935_s6, %s1662_s29  ;;  %p1671_p0 = scmp.lt.s32.totalorder %s1662_s29, %s1662_s29 }
  0x40   : > { %p1665_p7 = pnand %p1663_p5, %p1945_p13  ;;  %p1672_p1 = por %p1671_p0, %p1670_p12 }
  0x42   : > { %p1666_p9 = pneg %p1665_p7 }
  0x44   : > { %p1673_p4 = pnand %p1672_p1, %p1666_p9 }
  0x46   : > { %1676 = shalt.err (!%p1673_p4)
}
  0x47   : > { %s1831_s5 = smov 256   ;;  %s1832_s7 = smov 16  }
  0x48   : > { %1484 = dma.hbm_to_vmem [thread:$0]  (!%p1931_p11), %s2407_s2, 4096, %s1935_s6, [#allocation6], %s1831_s5, %s1831_s5, %s1832_s7  }
  0x49   : > { %s1833_s10 = smov [#allocation8]   ;;  %s1677_s21 = scalar_lea.hbm %s2408_s3, 64 }
  0x4a   : > { %s197_s11 = sshll.u32 %s1833_s10, 4  ;;  %p1678_p6 = scmp.ne.s32.totalorder %s2408_s3, %s1677_s21  ;;  %s198_s11 = int_to_ptr.vmem [resolvable:$true] %s197_s11 }
  0x4b   : > { %p1684_p5 = scmp.lt.u32.totalorder %s1677_s21, %s2408_s3 }
  0x4c   : > { %p1680_p10 = pnand %p1678_p6, %p1945_p13 }
  0x4e   : > { %p1681_p3 = pneg %p1680_p10 }
  0x50   : > { %p1686_p7 = pnand %p1684_p5, %p1681_p3 }
  0x52   : > { %1689 = shalt.err (!%p1686_p7)
}
  0x53   : > { %s1690_s6 = scalar_lea.vmem %s198_s11, 64  ;;  %p1698_p1 = scmp.lt.s32.totalorder %s198_s11, %s198_s11 }
  0x54   : > { %p1691_p9 = scmp.ne.s32.totalorder %s198_s11, %s1690_s6  ;;  %p1699_p4 = scmp.lt.s32.totalorder %s1690_s6, %s1690_s6 }
  0x56   : > { %p1693_p12 = pnand %p1691_p9, %p1945_p13  ;;  %p1700_p8 = por %p1699_p4, %p1698_p1 }
  0x58   : > { %p1694_p0 = pneg %p1693_p12 }
  0x5a   : > { %p1701_p2 = pnand %p1700_p8, %p1694_p0 }
  0x5c   : > { %1704 = shalt.err (!%p1701_p2)
}
  0x5d   : > { %1487 = dma.hbm_to_vmem [thread:$0]  (!%p1931_p11), %s2408_s3, 64, %s198_s11, [#allocation9]  }
  0x5e   : > { %s34_s1 = sadd.s32 1, %s1821_s19  ;;  %s43_s12 = sadd.s32 1, %s1813_s17 }
  0x5f   : > { %p36_p8 = scmp.ge.s32.totalorder %s34_s1, 2  ;;  %p50_p2 = scmp.ne.s32.totalorder %s1813_s17, %s1809_s16 }
  0x60   : > { %p51_p13 = scmp.eq.s32.totalorder %s1825_s20, 0  ;;  %p2426_p10 = scmp.ne.s32.totalorder %s2418_s24, 0 }
  0x61   : > { %s2442_s1 = smov (%p36_p8, %s34_s1), 0  ;;  %p1499_p11 = scmp.lt.s32.totalorder %s1825_s20, 2 }
  0x62   : > { %p2017_p6 = por %p51_p13, %p50_p2  ;;  %p2023_p3 = por %p2426_p10, %p50_p2 }
  0x63   : > { %s38_s7 = ssub.s32 %s1821_s19, %s2442_s1  ;;  %s208_s8 = sand.u32 1, %s1813_s17  }
  0x64   : > { %p41_p5 = scmp.eq.s32.totalorder %s38_s7, 0  ;;  %s1335_s9 = sshll.u32 %s208_s8, 6 }
  0x65   : > { %s1395_s11 = sshll.u32 %s1821_s19, 10  ;;  %s212_s24 = scalar_lea.vmem [#allocation2], %s1335_s9 }
  0x66   : > { %s2032_s10 = scalar_select %p41_p5, %s1813_s17, %s43_s12  }
  0x67   : > { %s2038_s21 = scalar_lea.hbm %s2405_s0, %s1395_s11  ;;  %s222_s29 = sshll.u32 %s212_s24, 4  ;;  %s2040_s29 = int_to_ptr.vmem [resolvable:$true] %s222_s29 }
  0x68   : > { %p2044_p7 = pnand %p1499_p11, %p2017_p6  ;;  %s2048_s22 = scalar_lea.sflag [#allocation3], %s208_s8 }
  0x69   : > { %s1705_s5 = scalar_lea.hbm %s2038_s21, 1024  ;;  %s1710_s30 = scalar_lea.hbm %s2405_s0, 2048 }
  0x6a   : > { %p1706_p9 = scmp.ne.s32.totalorder %s2038_s21, %s1705_s5  ;;  %p1707_p12 = pneg %p2044_p7 }
  0x6b   : > { %p1711_p4 = scmp.lt.u32.totalorder %s2038_s21, %s2405_s0  ;;  %p1712_p8 = scmp.lt.u32.totalorder %s1710_s30, %s1705_s5 }
  0x6c   : > { %p1708_p0 = pnand %p1707_p12, %p1706_p9  ;;  %p1714_p13 = scmp.lt.u32.totalorder %s1705_s5, %s2038_s21 }
  0x6d   : > { %p1713_p2 = por %p1712_p8, %p1711_p4 }
  0x6e   : > { %p1709_p1 = pneg %p1708_p0 }
  0x6f   : > { %p1715_p6 = por %p1714_p13, %p1713_p2 }
  0x71   : > { %p1716_p10 = pnand %p1715_p6, %p1709_p1 }
  0x73   : > { %1719 = shalt.err (!%p1716_p10)
}
  0x74   : > { %s1720_s8 = scalar_lea.vmem %s2040_s29, 1024  ;;  %s1834_s13 = smov [#allocation2]  }
  0x75   : > { %p1721_p11 = scmp.ne.s32.totalorder %s2040_s29, %s1720_s8  ;;  %s1725_s14 = sshll.u32 %s1834_s13, 4  ;;  %s1726_s14 = int_to_ptr.vmem [resolvable:$false] %s1725_s14 }
  0x76   : > { %s1727_s24 = scalar_lea.vmem %s1726_s14, 2048  ;;  %p1728_p0 = scmp.lt.s32.totalorder %s2040_s29, %s1726_s14 }
  0x77   : > { %p1723_p5 = pnand %p1721_p11, %p1707_p12  ;;  %p1729_p4 = scmp.lt.s32.totalorder %s1727_s24, %s1720_s8 }
  0x79   : > { %p1724_p9 = pneg %p1723_p5  ;;  %p1730_p8 = por %p1729_p4, %p1728_p0 }
  0x7b   : > { %p1731_p2 = pnand %p1730_p8, %p1724_p9 }
  0x7d   : > { %1734 = shalt.err (!%p1731_p2)
}
  0x7e   : > { %s2429_s5 = smov 4   ;;  %s2430_s12 = smov 64  }
  0x7f   : > { %1491 = dma.hbm_to_vmem [thread:$0]  (!%p2044_p7), %s2038_s21, 1024, %s2040_s29, %s2048_s22, %s2430_s12, %s2430_s12, %s2429_s5  }
  0x80   : > { %p2431_p12 = scmp.ne.s32.totalorder %s2421_s27, 0 }
  0x81   : > { %s2082_s7 = sand.u32 (!%p2431_p12), 1, %s1809_s16   ;;  %p2432_p1 = scmp.ne.s32.totalorder (!%p2431_p12), %s2419_s25, 0 }
  0x82   : > { %234 = sbr.rel (%p2431_p12) target bundleno = 686 (0x2ae), region = 36  ;;  %s1339_s30 = sshll.u32 (!%p2431_p12), %s2082_s7, 6 }
  0x83   : > { %s237_s9 = scalar_lea.sflag (!%p2431_p12), [#allocation3], %s2082_s7  ;;  %s2086_s11 = scalar_lea.vmem (!%p2431_p12), [#allocation2], %s1339_s30 }
  0x89   : > { %1788 = dma.done.wait (%p2432_p1), %s237_s9, 1024  }
  0x8a   : > { %1790 = vsyncadd (%p2432_p1), %s237_s9, 4294966272  ;;  %p2433_p7 = scmp.ne.s32.totalorder %s2417_s23, 0 }
  0x8c   : > { %1792 = dma.done.wait (%p2433_p7), [#allocation6], 4224  }
  0x8d   : > { %1794 = vsyncadd (%p2433_p7), [#allocation6], 4294963072 }
  0x8e   : > { %1796 = dma.done.wait (%p2433_p7), [#allocation9], 64  }
  0x8f   : > { %1798 = vsyncadd (%p2433_p7), [#allocation9], 4294967232  ;;  %v1835_v0 = vmov 0   ;;  %v1564_v1 = vld [vmem:[#allocation7 + $0xc] ss:$16 sps:$4 sm:$0xff]   ;;  %v1589_v29 = vld [vmem:[%s2086_s11 + $0x8] sm:$0xff]   ;;  %v330_v42 = vlaneseq }
  0x90   : > { %703 = vmatprep.mubr.bf16.mxu1 %v1835_v0  ;;  %590 = vmatprep.mubr.bf16.mxu0 %v1835_v0  ;;  %v1566_v2 = vld [vmem:[#allocation7 + $0x8] ss:$16 sps:$4 sm:$0xff]   ;;  %v1567_v3 = vld [vmem:[#allocation7 + $0x2c] ss:$16 sps:$4 sm:$0xff]   ;;  %v1596_v14 = vld [vmem:[#allocation7 + $0x4] ss:$16 sps:$4 sm:$0xff]  }
  0x91   : > { %671 = vmatprep.subr.bf16.mxu1 %v1564_v1  ;;  %v1569_v4 = vld [vmem:[#allocation7 + $0x28] ss:$16 sps:$4 sm:$0xff]   ;;  %v1570_v5 = vld [vmem:[#allocation7 + $0x4c] ss:$16 sps:$4 sm:$0xff]   ;;  %v1598_v15 = vld [vmem:[#allocation7] ss:$16 sps:$4 sm:$0xff]   ;;  %558 = vmatprep.subr.bf16.mxu0 %v1596_v14 }
  0x92   : > { %672 = vmatpush1.bf16.msra.mxu1 %v1566_v2  ;;  %v1572_v6 = vld [vmem:[#allocation7 + $0x48] ss:$16 sps:$4 sm:$0xff]   ;;  %v1573_v7 = vld [vmem:[#allocation7 + $0x6c] ss:$16 sps:$4 sm:$0xff]   ;;  %v1599_v16 = vld [vmem:[#allocation7 + $0x24] ss:$16 sps:$4 sm:$0xff]   ;;  %559 = vmatpush1.bf16.msra.mxu0 %v1598_v15 }
  0x93   : > { %673 = vmatprep.subr.bf16.mxu1 %v1567_v3  ;;  %v1575_v8 = vld [vmem:[#allocation7 + $0x68] ss:$16 sps:$4 sm:$0xff]   ;;  %v1576_v9 = vld [vmem:[#allocation7 + $0x8c] ss:$16 sps:$4 sm:$0xff]   ;;  %v1601_v17 = vld [vmem:[#allocation7 + $0x20] ss:$16 sps:$4 sm:$0xff]   ;;  %560 = vmatprep.subr.bf16.mxu0 %v1599_v16 }
  0x94   : > { %v1578_v10 = vld [vmem:[#allocation7 + $0x88] ss:$16 sps:$4 sm:$0xff]   ;;  %v1579_v11 = vld [vmem:[#allocation7 + $0xac] ss:$16 sps:$4 sm:$0xff]   ;;  %v1602_v19 = vld [vmem:[#allocation7 + $0x44] ss:$16 sps:$4 sm:$0xff]  }
  0x95   : > { %v1581_v12 = vld [vmem:[#allocation7 + $0xa8] ss:$16 sps:$4 sm:$0xff]   ;;  %v1582_v13 = vld [vmem:[#allocation7 + $0xcc] ss:$16 sps:$4 sm:$0xff]   ;;  %v1604_v21 = vld [vmem:[#allocation7 + $0x40] ss:$16 sps:$4 sm:$0xff]  }
  0x96   : > { %674 = vmatpush1.bf16.msra.mxu1 %v1569_v4  ;;  %v1584_v18 = vld [vmem:[#allocation7 + $0xc8] ss:$16 sps:$4 sm:$0xff]   ;;  %v1585_v20 = vld [vmem:[#allocation7 + $0xec] ss:$16 sps:$4 sm:$0xff]   ;;  %561 = vmatpush1.bf16.msra.mxu0 %v1601_v17  ;;  %v1605_v23 = vld [vmem:[#allocation7 + $0x64] ss:$16 sps:$4 sm:$0xff]  }
  0x97   : > { %675 = vmatprep.subr.bf16.mxu1 %v1570_v5  ;;  %v1587_v22 = vld [vmem:[#allocation7 + $0xe8] ss:$16 sps:$4 sm:$0xff]   ;;  %562 = vmatprep.subr.bf16.mxu0 %v1602_v19  ;;  %v1607_v25 = vld [vmem:[#allocation7 + $0x60] ss:$16 sps:$4 sm:$0xff]   ;;  %v1608_v26 = vld [vmem:[#allocation7 + $0x84] ss:$16 sps:$4 sm:$0xff]  }
  0x98   : > { %v1588_v24 = vld [vmem:[%s2086_s11] sm:$0xff]   ;;  %v1610_v27 = vld [vmem:[#allocation7 + $0x80] ss:$16 sps:$4 sm:$0xff]   ;;  %v1611_v28 = vld [vmem:[#allocation7 + $0xa4] ss:$16 sps:$4 sm:$0xff]   ;;  %v1836_v41 = vmov 0.0  }
  0x99   : > { %v1613_v30 = vld [vmem:[#allocation7 + $0xa0] ss:$16 sps:$4 sm:$0xff]   ;;  %v1614_v31 = vld [vmem:[#allocation7 + $0xc4] ss:$16 sps:$4 sm:$0xff]   ;;  %v1590_v34 = vld [vmem:[%s2086_s11 + $0x10] sm:$0xff]   ;;  %vm1837_vm0 = vmmov 0  }
  0x9a   : > { %676 = vmatpush1.bf16.msra.mxu1 %v1572_v6  ;;  %563 = vmatpush1.bf16.msra.mxu0 %v1604_v21  ;;  %v1616_v32 = vld [vmem:[#allocation7 + $0xc0] ss:$16 sps:$4 sm:$0xff]   ;;  %v1617_v33 = vld [vmem:[#allocation7 + $0xe4] ss:$16 sps:$4 sm:$0xff]   ;;  %v1592_v37 = vld [vmem:[%s2086_s11 + $0x20] sm:$0xff]   ;;  %v2130_v43 = vshrl.u32 %v330_v42, 7 }
  0x9b   : > { %677 = vmatprep.subr.bf16.mxu1 %v1573_v7  ;;  %564 = vmatprep.subr.bf16.mxu0 %v1605_v23  ;;  %v1619_v35 = vld [vmem:[#allocation7 + $0xe0] ss:$16 sps:$4 sm:$0xff]   ;;  %v1594_v39 = vld [vmem:[%s2086_s11 + $0x30] sm:$0xff]   ;;  %v2144_v54 = vld [vmem:[#allocation5] sm:$0xff]   ;;  %vm799_vm1 = vcmask 130048   ;;  %s1460_s23 = smul.u32 384, %s2082_s7 }
  0x9c   : > { %v1591_v36 = vld [vmem:[%s2086_s11 + $0x18] sm:$0xff]   ;;  %v1593_v38 = vld [vmem:[%s2086_s11 + $0x28] sm:$0xff]   ;;  %v344_v44 = vsub.s32 3, %v2130_v43  ;;  %v332_v61 = vsub.s32 0, %v2130_v43  ;;  %v336_v62 = vsub.s32 1, %v2130_v43  ;;  %s1461_s27 = smul.u32 6144, %s1817_s18 }
  0x9d   : > { %v1595_v40 = vld [vmem:[%s2086_s11 + $0x38] sm:$0xff]   ;;  %v2133_v45 = vld [vmem:[#allocation8] sm:$0xf]  ;;  %s2179_s25 = scalar_lea.vmem [#allocation10], %s1460_s23  ;;  %s1196_s18 = scalar_lea.sflag [#allocation4], %s2082_s7 }
  0x9e   : > { %678 = vmatpush1.bf16.msra.mxu1 %v1575_v8  ;;  %565 = vmatpush1.bf16.msra.mxu0 %v1607_v25  ;;  %v2138_v47 = vrot.slane %v2133_v45, %v344_v44  ;;  %v2163_v1 = vrot.slane %v2133_v45, %v332_v61  ;;  %v2167_v3 = vrot.slane %v2133_v45, %v336_v62  ;;  %s1212_s21 = sshll.u32 %s2179_s25, 4  ;;  %s2352_s22 = scalar_lea.hbm %s2409_s4, %s1461_s27  ;;  %s2354_s21 = int_to_ptr.vmem [resolvable:$true] %s1212_s21 }
  0x9f   : > { %679 = vmatprep.subr.bf16.mxu1 %v1576_v9  ;;  %566 = vmatprep.subr.bf16.mxu0 %v1608_v26  ;;  %s1735_s8 = scalar_lea.vmem %s2354_s21, 6144  ;;  %s1838_s13 = smov [#allocation10]  }
  0xa0   : > { %p1736_p13 = scmp.ne.s32.totalorder %s2354_s21, %s1735_s8  ;;  %s1739_s14 = sshll.u32 %s1838_s13, 4  ;;  %s1740_s14 = int_to_ptr.vmem [resolvable:$false] %s1739_s14 }
  0xa1   : > { %s1741_s24 = scalar_lea.vmem %s1740_s14, 12288  ;;  %p1742_p11 = scmp.lt.s32.totalorder %s2354_s21, %s1740_s14 }
  0xa2   : > { %680 = vmatpush1.bf16.msra.mxu1 %v1578_v10  ;;  %567 = vmatpush1.bf16.msra.mxu0 %v1610_v27  ;;  %p1737_p6 = pnand %p1736_p13, %p2023_p3  ;;  %p1743_p5 = scmp.lt.s32.totalorder %s1741_s24, %s1735_s8 }
  0xa3   : > { %681 = vmatprep.subr.bf16.mxu1 %v1579_v11  ;;  %568 = vmatprep.subr.bf16.mxu0 %v1611_v28 }
  0xa4   : > { %p1738_p10 = pneg %p1737_p6  ;;  %p1744_p9 = por %p1743_p5, %p1742_p11 }
  0xa6   : > { %682 = vmatpush1.bf16.msra.mxu1 %v1581_v12  ;;  %569 = vmatpush1.bf16.msra.mxu0 %v1613_v30  ;;  %p1745_p0 = pnand %p1744_p9, %p1738_p10 }
  0xa7   : > { %683 = vmatprep.subr.bf16.mxu1 %v1582_v13  ;;  %570 = vmatprep.subr.bf16.mxu0 %v1614_v31 }
  0xaa   : > { %684 = vmatpush1.bf16.msra.mxu1 %v1584_v18  ;;  %571 = vmatpush1.bf16.msra.mxu0 %v1616_v32 }
  0xab   : > { %685 = vmatprep.subr.bf16.mxu1 %v1585_v20  ;;  %572 = vmatprep.subr.bf16.mxu0 %v1617_v33 }
  0xae   : > { %686 = vmatpush1.bf16.msra.mxu1 %v1587_v22  ;;  %573 = vmatpush1.bf16.msra.mxu0 %v1619_v35 }
  0xaf   : > { %1412 = vmatprep.subr.bf16.mxu0 %v1836_v41  ;;  %1418 = vmatprep.subr.bf16.mxu1 %v1836_v41 }
  0xb1   : > { %704 = vmatmul.mubr.bf16.vlgmr.msra.gmra.mrb[0].mxu1 %v1588_v24  ;;  %591 = vmatmul.mubr.bf16.vlgmr.msra.gmra.mrb[0].mxu0 %v1588_v24 }
  0xb2   : > { %713 = vmatprep.mubr.bf16.mxu1 %v1835_v0  ;;  %600 = vmatprep.mubr.bf16.mxu0 %v1835_v0 }
  0xb9   : > { %714 = vmatmul.mubr.bf16.gmra.mrb[4].mxu1 %v1589_v29  ;;  %601 = vmatmul.mubr.bf16.gmra.mrb[4].mxu0 %v1589_v29 }
  0xba   : > { %723 = vmatprep.mubr.bf16.mxu1 %v1835_v0  ;;  %610 = vmatprep.mubr.bf16.mxu0 %v1835_v0 }
  0xc1   : > { %724 = vmatmul.mubr.bf16.gmra.mrb[8].mxu1 %v1590_v34  ;;  %611 = vmatmul.mubr.bf16.gmra.mrb[8].mxu0 %v1590_v34 }
  0xc2   : > { %733 = vmatprep.mubr.bf16.mxu1 %v1835_v0  ;;  %620 = vmatprep.mubr.bf16.mxu0 %v1835_v0 }
  0xc9   : > { %734 = vmatmul.mubr.bf16.gmra.mrb[12].mxu1 %v1591_v36  ;;  %621 = vmatmul.mubr.bf16.gmra.mrb[12].mxu0 %v1591_v36 }
  0xca   : > { %743 = vmatprep.mubr.bf16.mxu1 %v1835_v0  ;;  %630 = vmatprep.mubr.bf16.mxu0 %v1835_v0 }
  0xd1   : > { %744 = vmatmul.mubr.bf16.gmra.mrb[16].mxu1 %v1592_v37  ;;  %631 = vmatmul.mubr.bf16.gmra.mrb[16].mxu0 %v1592_v37 }
  0xd2   : > { %753 = vmatprep.mubr.bf16.mxu1 %v1835_v0  ;;  %640 = vmatprep.mubr.bf16.mxu0 %v1835_v0 }
  0xd9   : > { %754 = vmatmul.mubr.bf16.gmra.mrb[20].mxu1 %v1593_v38  ;;  %641 = vmatmul.mubr.bf16.gmra.mrb[20].mxu0 %v1593_v38 }
  0xda   : > { %763 = vmatprep.mubr.bf16.mxu1 %v1835_v0  ;;  %650 = vmatprep.mubr.bf16.mxu0 %v1835_v0 }
  0xe1   : > { %764 = vmatmul.mubr.bf16.gmra.mrb[24].mxu1 %v1594_v39  ;;  %651 = vmatmul.mubr.bf16.gmra.mrb[24].mxu0 %v1594_v39 }
  0xe2   : > { %773 = vmatprep.mubr.bf16.mxu1 %v1835_v0  ;;  %660 = vmatprep.mubr.bf16.mxu0 %v1835_v0 }
  0xe9   : > { %774 = vmatmul.mubr.bf16.gmra.mrb[28].mxu1 %v1595_v40  ;;  %661 = vmatmul.mubr.bf16.gmra.mrb[28].mxu0 %v1595_v40 }
  0xea   : > { %1414 = vmatprep.mubr.msk.bf16.mxu0 %vm1837_vm0, %v1836_v41  ;;  %1420 = vmatprep.mubr.msk.bf16.mxu1 %vm1837_vm0, %v1836_v41 }
 0x184   : > { %v2135_v46 = vpop.f32.mrb[0].mxu1  ;;  %v592_v6 = vpop.f32.mrb[0].mxu0 }
 0x185   : > { %v707_v48 = vpop.f32.mrb[1].mxu1  ;;  %v593_v9 = vadd.f32 %v592_v6, %v2163_v1  ;;  %v594_v10 = vpop.f32.mrb[1].mxu0 }
 0x186   : > { %v2140_v49 = vpop.f32.mrb[2].mxu1  ;;  %v708_v51 = vadd.f32 %v707_v48, %v2138_v47  ;;  %v595_v11 = vadd.f32 %v594_v10, %v2167_v3  ;;  %v596_v12 = vpop.f32.mrb[2].mxu0 }
 0x187   : > { %v711_v50 = vpop.f32.mrb[3].mxu1  ;;  %1147 = vst [vmem:[%s2179_s25] sm:$0xff] %v593_v9  ;;  %v597_v14 = vadd.f32 %v596_v12, %v2163_v1  ;;  %v598_v15 = vpop.f32.mrb[3].mxu0 }
 0x188   : > { %v712_v52 = vadd.f32 %v711_v50, %v2138_v47  ;;  %1148 = vst [vmem:[%s2179_s25 + $0x8] sm:$0xff] %v595_v11  ;;  %v599_v16 = vadd.f32 %v598_v15, %v2167_v3 }
 0x189   : > { %1150 = vst [vmem:[%s2179_s25 + $0x18] sm:$0xff] %v597_v14 }
 0x18a   : > { %v784_v53 = vpack.c.bf16 %v712_v52, %v708_v51  ;;  %1151 = vst [vmem:[%s2179_s25 + $0x20] sm:$0xff] %v599_v16 }
 0x18c   : > { %v2146_v55 = vpop.f32.mrb[4].mxu1  ;;  %1413 = vmatpush3.bf16.msra.mxu0 %v784_v53  ;;  %v602_v21 = vpop.f32.mrb[4].mxu0 }
 0x18d   : > { %v717_v56 = vpop.f32.mrb[5].mxu1  ;;  %1424 = vmatprep.subr.bf16.mxu0 %v1836_v41  ;;  %v603_v24 = vadd.f32 %v602_v21, %v2163_v1  ;;  %v604_v25 = vpop.f32.mrb[5].mxu0 }
 0x18e   : > { %v2149_v57 = vpop.f32.mrb[6].mxu1  ;;  %v718_v59 = vadd.f32 %v717_v56, %v2138_v47  ;;  %v605_v26 = vadd.f32 %v604_v25, %v2167_v3  ;;  %v606_v27 = vpop.f32.mrb[6].mxu0 }
 0x18f   : > { %v721_v58 = vpop.f32.mrb[7].mxu1  ;;  %1415 = vmatmul.mubr.msk.bf16.vlgmr.msra.gmra.mrb[32].mxu0 %vm799_vm1, %v2144_v54  ;;  %1153 = vst [vmem:[%s2179_s25 + $0x30] sm:$0xff] %v603_v24  ;;  %v607_v29 = vadd.f32 %v606_v27, %v2163_v1  ;;  %v608_v30 = vpop.f32.mrb[7].mxu0 }
 0x190   : > { %v722_v60 = vadd.f32 %v721_v58, %v2138_v47  ;;  %1426 = vmatprep.mubr.msk.bf16.mxu0 %vm1837_vm0, %v1836_v41  ;;  %1154 = vst [vmem:[%s2179_s25 + $0x38] sm:$0xff] %v605_v26  ;;  %v609_v31 = vadd.f32 %v608_v30, %v2167_v3 }
 0x191   : > { %1156 = vst [vmem:[%s2179_s25 + $0x48] sm:$0xff] %v607_v29 }
 0x192   : > { %v785_v63 = vpack.c.bf16 %v722_v60, %v718_v59  ;;  %1157 = vst [vmem:[%s2179_s25 + $0x50] sm:$0xff] %v609_v31 }
 0x194   : > { %v2160_v0 = vpop.f32.mrb[8].mxu1  ;;  %1419 = vmatpush3.bf16.msra.mxu1 %v785_v63  ;;  %v612_v36 = vpop.f32.mrb[8].mxu0 }
 0x195   : > { %v727_v2 = vpop.f32.mrb[9].mxu1  ;;  %1430 = vmatprep.subr.bf16.mxu1 %v1836_v41  ;;  %v613_v39 = vadd.f32 %v612_v36, %v2163_v1  ;;  %v614_v40 = vpop.f32.mrb[9].mxu0 }
 0x196   : > { %v2169_v4 = vpop.f32.mrb[10].mxu1  ;;  %v728_v7 = vadd.f32 %v727_v2, %v2138_v47  ;;  %v615_v42 = vadd.f32 %v614_v40, %v2167_v3  ;;  %v616_v44 = vpop.f32.mrb[10].mxu0 }
 0x197   : > { %v731_v5 = vpop.f32.mrb[11].mxu1  ;;  %1421 = vmatmul.mubr.msk.bf16.vlgmr.msra.gmra.mrb[32].mxu1 %vm799_vm1, %v2144_v54  ;;  %1159 = vst [vmem:[%s2179_s25 + $0x60] sm:$0xff] %v613_v39  ;;  %v617_v50 = vadd.f32 %v616_v44, %v2163_v1  ;;  %v618_v51 = vpop.f32.mrb[11].mxu0 }
 0x198   : > { %v732_v8 = vadd.f32 %v731_v5, %v2138_v47  ;;  %1432 = vmatprep.mubr.msk.bf16.mxu1 %vm1837_vm0, %v1836_v41  ;;  %1160 = vst [vmem:[%s2179_s25 + $0x68] sm:$0xff] %v615_v42  ;;  %v619_v52 = vadd.f32 %v618_v51, %v2167_v3 }
 0x199   : > { %1162 = vst [vmem:[%s2179_s25 + $0x78] sm:$0xff] %v617_v50 }
 0x19a   : > { %v786_v13 = vpack.c.bf16 %v732_v8, %v728_v7  ;;  %1163 = vst [vmem:[%s2179_s25 + $0x80] sm:$0xff] %v619_v52 }
 0x19c   : > { %v2185_v17 = vpop.f32.mrb[12].mxu1  ;;  %1425 = vmatpush3.bf16.msra.mxu0 %v786_v13  ;;  %v622_v60 = vpop.f32.mrb[12].mxu0 }
 0x19d   : > { %v737_v18 = vpop.f32.mrb[13].mxu1  ;;  %1436 = vmatprep.subr.bf16.mxu0 %v1836_v41  ;;  %v623_v63 = vadd.f32 %v622_v60, %v2163_v1  ;;  %v624_v2 = vpop.f32.mrb[13].mxu0 }
 0x19e   : > { %v2190_v19 = vpop.f32.mrb[14].mxu1  ;;  %v738_v22 = vadd.f32 %v737_v18, %v2138_v47  ;;  %v625_v5 = vadd.f32 %v624_v2, %v2167_v3  ;;  %v626_v6 = vpop.f32.mrb[14].mxu0 }
 0x19f   : > { %v741_v20 = vpop.f32.mrb[15].mxu1  ;;  %1427 = vmatmul.mubr.msk.bf16.vlgmr.msra.gmra.mrb[36].mxu0 %vm799_vm1, %v2144_v54  ;;  %1165 = vst [vmem:[%s2179_s25 + $0x90] sm:$0xff] %v623_v63  ;;  %v627_v8 = vadd.f32 %v626_v6, %v2163_v1  ;;  %v628_v9 = vpop.f32.mrb[15].mxu0 }
 0x1a0   : > { %v742_v23 = vadd.f32 %v741_v20, %v2138_v47  ;;  %1438 = vmatprep.mubr.msk.bf16.mxu0 %vm1837_vm0, %v1836_v41  ;;  %1166 = vst [vmem:[%s2179_s25 + $0x98] sm:$0xff] %v625_v5  ;;  %v629_v10 = vadd.f32 %v628_v9, %v2167_v3  ;;  %v340_v9 = vsub.s32 2, %v2130_v43 }
 0x1a1   : > { %1168 = vst [vmem:[%s2179_s25 + $0xa8] sm:$0xff] %v627_v8 }
 0x1a2   : > { %v787_v28 = vpack.c.bf16 %v742_v23, %v738_v22  ;;  %1169 = vst [vmem:[%s2179_s25 + $0xb0] sm:$0xff] %v629_v10  ;;  %v2299_v10 = vrot.slane %v2133_v45, %v340_v9 }
 0x1a4   : > { %v2204_v32 = vpop.f32.mrb[16].mxu1  ;;  %1431 = vmatpush3.bf16.msra.mxu1 %v787_v28  ;;  %v632_v15 = vpop.f32.mrb[16].mxu0  ;;  %v716_v43 = vadd.f32 %v2146_v55, %v2299_v10  ;;  %v730_v55 = vadd.f32 %v2169_v4, %v2299_v10 }
 0x1a5   : > { %v747_v33 = vpop.f32.mrb[17].mxu1  ;;  %1442 = vmatprep.subr.bf16.mxu1 %v1836_v41  ;;  %v633_v20 = vadd.f32 %v632_v15, %v2163_v1  ;;  %v634_v21 = vpop.f32.mrb[17].mxu0 }
 0x1a6   : > { %v2209_v34 = vpop.f32.mrb[18].mxu1  ;;  %v748_v37 = vadd.f32 %v747_v33, %v2138_v47  ;;  %v635_v22 = vadd.f32 %v634_v21, %v2167_v3  ;;  %v636_v23 = vpop.f32.mrb[18].mxu0 }
 0x1a7   : > { %v751_v35 = vpop.f32.mrb[19].mxu1  ;;  %1433 = vmatmul.mubr.msk.bf16.vlgmr.msra.gmra.mrb[36].mxu1 %vm799_vm1, %v2144_v54  ;;  %1171 = vst [vmem:[%s2179_s25 + $0xc0] sm:$0xff] %v633_v20  ;;  %v637_v25 = vadd.f32 %v636_v23, %v2163_v1  ;;  %v638_v26 = vpop.f32.mrb[19].mxu0 }
 0x1a8   : > { %v752_v38 = vadd.f32 %v751_v35, %v2138_v47  ;;  %1444 = vmatprep.mubr.msk.bf16.mxu1 %vm1837_vm0, %v1836_v41  ;;  %1172 = vst [vmem:[%s2179_s25 + $0xc8] sm:$0xff] %v635_v22  ;;  %v639_v27 = vadd.f32 %v638_v26, %v2167_v3 }
 0x1a9   : > { %1174 = vst [vmem:[%s2179_s25 + $0xd8] sm:$0xff] %v637_v25  ;;  %v726_v25 = vadd.f32 %v2160_v0, %v2299_v10  ;;  %v740_v0 = vadd.f32 %v2190_v19, %v2299_v10 }
 0x1aa   : > { %v788_v48 = vpack.c.bf16 %v752_v38, %v748_v37  ;;  %1175 = vst [vmem:[%s2179_s25 + $0xe0] sm:$0xff] %v639_v27 }
 0x1ac   : > { %v2223_v53 = vpop.f32.mrb[20].mxu1  ;;  %1437 = vmatpush3.bf16.msra.mxu0 %v788_v48  ;;  %v642_v31 = vpop.f32.mrb[20].mxu0 }
 0x1ad   : > { %v757_v56 = vpop.f32.mrb[21].mxu1  ;;  %1448 = vmatprep.subr.bf16.mxu0 %v1836_v41  ;;  %v643_v36 = vadd.f32 %v642_v31, %v2163_v1  ;;  %v644_v37 = vpop.f32.mrb[21].mxu0 }
 0x1ae   : > { %v2228_v58 = vpop.f32.mrb[22].mxu1  ;;  %v758_v61 = vadd.f32 %v757_v56, %v2138_v47  ;;  %v645_v38 = vadd.f32 %v644_v37, %v2167_v3  ;;  %v646_v39 = vpop.f32.mrb[22].mxu0 }
 0x1af   : > { %v761_v59 = vpop.f32.mrb[23].mxu1  ;;  %1439 = vmatmul.mubr.msk.bf16.vlgmr.msra.gmra.mrb[40].mxu0 %vm799_vm1, %v2144_v54  ;;  %1177 = vst [vmem:[%s2179_s25 + $0xf0] sm:$0xff] %v643_v36  ;;  %v647_v42 = vadd.f32 %v646_v39, %v2163_v1  ;;  %v648_v44 = vpop.f32.mrb[23].mxu0 }
 0x1b0   : > { %v762_v62 = vadd.f32 %v761_v59, %v2138_v47  ;;  %1450 = vmatprep.mubr.msk.bf16.mxu0 %vm1837_vm0, %v1836_v41  ;;  %1178 = vst [vmem:[%s2179_s25 + $0xf8] sm:$0xff] %v645_v38  ;;  %v649_v48 = vadd.f32 %v648_v44, %v2167_v3 }
 0x1b1   : > { %1180 = vst [vmem:[%s2179_s25 + $0x108] sm:$0xff] %v647_v42 }
 0x1b2   : > { %v789_v7 = vpack.c.bf16 %v762_v62, %v758_v61  ;;  %1181 = vst [vmem:[%s2179_s25 + $0x110] sm:$0xff] %v649_v48 }
 0x1b4   : > { %v2242_v11 = vpop.f32.mrb[24].mxu1  ;;  %1443 = vmatpush3.bf16.msra.mxu1 %v789_v7 }
 0x1b5   : > { %v767_v12 = vpop.f32.mrb[25].mxu1  ;;  %1454 = vmatprep.subr.bf16.mxu1 %v1836_v41 }
 0x1b6   : > { %v2247_v13 = vpop.f32.mrb[26].mxu1  ;;  %v768_v16 = vadd.f32 %v767_v12, %v2138_v47  ;;  %v706_v12 = vadd.f32 %v2135_v46, %v2299_v10  ;;  %v720_v46 = vadd.f32 %v2149_v57, %v2299_v10 }
 0x1b7   : > { %v771_v14 = vpop.f32.mrb[27].mxu1  ;;  %1445 = vmatmul.mubr.msk.bf16.vlgmr.msra.gmra.mrb[40].mxu1 %vm799_vm1, %v2144_v54 }
 0x1b8   : > { %v772_v18 = vadd.f32 %v771_v14, %v2138_v47  ;;  %1456 = vmatprep.mubr.msk.bf16.mxu1 %vm1837_vm0, %v1836_v41 }
 0x1ba   : > { %v790_v24 = vpack.c.bf16 %v772_v18, %v768_v16 }
 0x1bc   : > { %v2261_v28 = vpop.f32.mrb[28].mxu1  ;;  %1449 = vmatpush3.bf16.msra.mxu0 %v790_v24 }
 0x1bd   : > { %v777_v41 = vpop.f32.mrb[29].mxu1 }
 0x1be   : > { %v2265_v29 = vpop.f32.mrb[30].mxu1  ;;  %v778_v33 = vadd.f32 %v777_v41, %v2138_v47 }
 0x1bf   : > { %v781_v30 = vpop.f32.mrb[31].mxu1  ;;  %1451 = vmatmul.mubr.msk.bf16.vlgmr.msra.gmra.mrb[44].mxu0 %vm799_vm1, %v2144_v54 }
 0x1c0   : > { %v782_v35 = vadd.f32 %v781_v30, %v2138_v47  ;;  %v652_v47 = vpop.f32.mrb[24].mxu0 }
 0x1c1   : > { %v653_v50 = vadd.f32 %v652_v47, %v2163_v1  ;;  %v654_v51 = vpop.f32.mrb[25].mxu0 }
 0x1c2   : > { %v791_v40 = vpack.c.bf16 %v782_v35, %v778_v33  ;;  %v655_v52 = vadd.f32 %v654_v51, %v2167_v3  ;;  %v656_v56 = vpop.f32.mrb[26].mxu0  ;;  %v736_v33 = vadd.f32 %v2185_v17, %v2299_v10  ;;  %v750_v17 = vadd.f32 %v2209_v34, %v2299_v10 }
 0x1c3   : > { %1183 = vst [vmem:[%s2179_s25 + $0x120] sm:$0xff] %v653_v50  ;;  %v657_v59 = vadd.f32 %v656_v56, %v2163_v1  ;;  %v658_v60 = vpop.f32.mrb[27].mxu0  ;;  %v756_v51 = vadd.f32 %v2223_v53, %v2299_v10  ;;  %v770_v53 = vadd.f32 %v2247_v13, %v2299_v10  ;;  %v780_v13 = vadd.f32 %v2265_v29, %v2299_v10 }
 0x1c4   : > { %1455 = vmatpush3.bf16.msra.mxu1 %v791_v40  ;;  %1184 = vst [vmem:[%s2179_s25 + $0x128] sm:$0xff] %v655_v52  ;;  %v659_v61 = vadd.f32 %v658_v60, %v2167_v3  ;;  %v746_v40 = vadd.f32 %v2204_v32, %v2299_v10  ;;  %v760_v32 = vadd.f32 %v2228_v58, %v2299_v10 }
 0x1c5   : > { %1186 = vst [vmem:[%s2179_s25 + $0x138] sm:$0xff] %v657_v59 }
 0x1c6   : > { %1187 = vst [vmem:[%s2179_s25 + $0x140] sm:$0xff] %v659_v61 }
 0x1c7   : > { %1457 = vmatmul.mubr.msk.bf16.vlgmr.msra.gmra.mrb[44].mxu1 %vm799_vm1, %v2144_v54  ;;  %v662_v54 = vpop.f32.mrb[28].mxu0 }
 0x1c8   : > { %v663_v62 = vadd.f32 %v662_v54, %v2163_v1  ;;  %v664_v63 = vpop.f32.mrb[29].mxu0  ;;  %v766_v54 = vadd.f32 %v2242_v11, %v2299_v10 }
 0x1c9   : > { %v665_v2 = vadd.f32 %v664_v63, %v2167_v3  ;;  %v666_v5 = vpop.f32.mrb[30].mxu0 }
 0x1ca   : > { %1189 = vst [vmem:[%s2179_s25 + $0x150] sm:$0xff] %v663_v62  ;;  %v667_v6 = vadd.f32 %v666_v5, %v2163_v1  ;;  %v668_v7 = vpop.f32.mrb[31].mxu0  ;;  %v710_v1 = vadd.f32 %v2140_v49, %v2299_v10 }
 0x1cb   : > { %1190 = vst [vmem:[%s2179_s25 + $0x158] sm:$0xff] %v665_v2  ;;  %v669_v8 = vadd.f32 %v668_v7, %v2167_v3  ;;  %v776_v7 = vadd.f32 %v2261_v28, %v2299_v10 }
 0x1cc   : > { %1192 = vst [vmem:[%s2179_s25 + $0x168] sm:$0xff] %v667_v6 }
 0x1cd   : > { %1193 = vst [vmem:[%s2179_s25 + $0x170] sm:$0xff] %v669_v8 }
 0x262   : > { %v837_v14 = vpop.f32.mrb[32].mxu0 }
 0x263   : > { %v1131_v15 = vadd.f32 %v837_v14, %v706_v12  ;;  %v1416_v16 = vpop.f32.mrb[33].mxu0 }
 0x264   : > { %v840_v18 = vpop.f32.mrb[34].mxu0 }
 0x265   : > { %1149 = vst [vmem:[%s2179_s25 + $0x10] sm:$0xff] %v1131_v15  ;;  %v1132_v3 = vadd.f32 %v840_v18, %v710_v1  ;;  %v1417_v20 = vpop.f32.mrb[35].mxu0 }
 0x267   : > { %1152 = vst [vmem:[%s2179_s25 + $0x28] sm:$0xff] %v1132_v3 }
 0x26a   : > { %v878_v45 = vpop.f32.mrb[32].mxu1 }
 0x26b   : > { %v1133_v21 = vadd.f32 %v878_v45, %v716_v43  ;;  %v1422_v22 = vpop.f32.mrb[33].mxu1 }
 0x26c   : > { %v881_v49 = vpop.f32.mrb[34].mxu1 }
 0x26d   : > { %1155 = vst [vmem:[%s2179_s25 + $0x40] sm:$0xff] %v1133_v21  ;;  %v1134_v23 = vadd.f32 %v881_v49, %v720_v46  ;;  %v1423_v24 = vpop.f32.mrb[35].mxu1 }
 0x26f   : > { %1158 = vst [vmem:[%s2179_s25 + $0x58] sm:$0xff] %v1134_v23 }
 0x272   : > { %v919_v26 = vpop.f32.mrb[36].mxu0 }
 0x273   : > { %v1135_v27 = vadd.f32 %v919_v26, %v726_v25  ;;  %v1428_v41 = vpop.f32.mrb[37].mxu0 }
 0x274   : > { %v922_v57 = vpop.f32.mrb[38].mxu0 }
 0x275   : > { %1161 = vst [vmem:[%s2179_s25 + $0x70] sm:$0xff] %v1135_v27  ;;  %v1136_v30 = vadd.f32 %v922_v57, %v730_v55  ;;  %v1429_v31 = vpop.f32.mrb[39].mxu0 }
 0x277   : > { %1164 = vst [vmem:[%s2179_s25 + $0x88] sm:$0xff] %v1136_v30 }
 0x27a   : > { %v960_v35 = vpop.f32.mrb[36].mxu1 }
 0x27b   : > { %v1137_v36 = vadd.f32 %v960_v35, %v736_v33  ;;  %v1434_v37 = vpop.f32.mrb[37].mxu1 }
 0x27c   : > { %v963_v4 = vpop.f32.mrb[38].mxu1 }
 0x27d   : > { %1167 = vst [vmem:[%s2179_s25 + $0xa0] sm:$0xff] %v1137_v36  ;;  %v1138_v38 = vadd.f32 %v963_v4, %v740_v0  ;;  %v1435_v39 = vpop.f32.mrb[39].mxu1 }
 0x27f   : > { %1170 = vst [vmem:[%s2179_s25 + $0xb8] sm:$0xff] %v1138_v38 }
 0x282   : > { %v1001_v42 = vpop.f32.mrb[40].mxu0 }
 0x283   : > { %v1139_v44 = vadd.f32 %v1001_v42, %v746_v40  ;;  %v1440_v48 = vpop.f32.mrb[41].mxu0 }
 0x284   : > { %v1004_v19 = vpop.f32.mrb[42].mxu0 }
 0x285   : > { %1173 = vst [vmem:[%s2179_s25 + $0xd0] sm:$0xff] %v1139_v44  ;;  %v1140_v47 = vadd.f32 %v1004_v19, %v750_v17  ;;  %v1441_v50 = vpop.f32.mrb[43].mxu0 }
 0x287   : > { %1176 = vst [vmem:[%s2179_s25 + $0xe8] sm:$0xff] %v1140_v47 }
 0x28a   : > { %v1042_v52 = vpop.f32.mrb[40].mxu1 }
 0x28b   : > { %v1141_v56 = vadd.f32 %v1042_v52, %v756_v51  ;;  %v1446_v59 = vpop.f32.mrb[41].mxu1 }
 0x28c   : > { %v1045_v34 = vpop.f32.mrb[42].mxu1 }
 0x28d   : > { %1179 = vst [vmem:[%s2179_s25 + $0x100] sm:$0xff] %v1141_v56  ;;  %v1142_v60 = vadd.f32 %v1045_v34, %v760_v32  ;;  %v1447_v61 = vpop.f32.mrb[43].mxu1 }
 0x28f   : > { %1182 = vst [vmem:[%s2179_s25 + $0x118] sm:$0xff] %v1142_v60 }
 0x292   : > { %v1083_v62 = vpop.f32.mrb[44].mxu0 }
 0x293   : > { %v1143_v63 = vadd.f32 %v1083_v62, %v766_v54  ;;  %v1452_v2 = vpop.f32.mrb[45].mxu0 }
 0x294   : > { %v1086_v58 = vpop.f32.mrb[46].mxu0 }
 0x295   : > { %1185 = vst [vmem:[%s2179_s25 + $0x130] sm:$0xff] %v1143_v63  ;;  %v1144_v5 = vadd.f32 %v1086_v58, %v770_v53  ;;  %v1453_v6 = vpop.f32.mrb[47].mxu0 }
 0x297   : > { %1188 = vst [vmem:[%s2179_s25 + $0x148] sm:$0xff] %v1144_v5 }
 0x29a   : > { %v1124_v11 = vpop.f32.mrb[44].mxu1 }
 0x29b   : > { %v1145_v8 = vadd.f32 %v1124_v11, %v776_v7  ;;  %v1458_v9 = vpop.f32.mrb[45].mxu1 }
 0x29c   : > { %v1127_v12 = vpop.f32.mrb[46].mxu1 }
 0x29d   : > { %1191 = vst [vmem:[%s2179_s25 + $0x160] sm:$0xff] %v1145_v8  ;;  %v1146_v28 = vadd.f32 %v1127_v12, %v780_v13  ;;  %v1459_v14 = vpop.f32.mrb[47].mxu1 }
 0x29f   : > { %1194 = vst [vmem:[%s2179_s25 + $0x178] sm:$0xff] %v1146_v28 }
 0x2a0   : > { %1748 = shalt.err (!%p1745_p0)
}
 0x2a1   : > { %s1749_s5 = scalar_lea.hbm %s2352_s22, 6144  ;;  %s1753_s9 = scalar_lea.hbm %s2409_s4, 12288 }
 0x2a2   : > { %p1750_p4 = scmp.ne.s32.totalorder %s2352_s22, %s1749_s5  ;;  %p1754_p12 = scmp.lt.u32.totalorder %s2352_s22, %s2409_s4 }
 0x2a3   : > { %p1755_p1 = scmp.lt.u32.totalorder %s1753_s9, %s1749_s5  ;;  %p1757_p13 = scmp.lt.u32.totalorder %s1749_s5, %s2352_s22 }
 0x2a4   : > { %p1751_p8 = pnand %p1750_p4, %p2023_p3 }
 0x2a5   : > { %p1756_p7 = por %p1755_p1, %p1754_p12 }
 0x2a6   : > { %p1752_p2 = pneg %p1751_p8 }
 0x2a7   : > { %p1758_p6 = por %p1757_p13, %p1756_p7 }
 0x2a9   : > { %p1759_p10 = pnand %p1758_p6, %p1752_p2 }
 0x2ab   : > { %1762 = shalt.err (!%p1759_p10)
}
 0x2ac   : > { %s1839_s25 = smov 384   ;;  %s1840_s27 = smov 24  }
 0x2ad   : > { %1476 = dma.vmem_to_hbm [thread:$0]  (%p2023_p3), %s2354_s21, 6144, %s2352_s22, %s1196_s18, %s1839_s25, %s1839_s25, %s1840_s27  }
 0x2ae PF: > { %s1227_s29 = sand.u32 1, %s1805_s15   ;;  %p2434_p11 = scmp.ne.s32.totalorder %s2420_s26, 0 }
 0x2af   : > { %p2435_p5 = scmp.ge.s32.totalorder %s1825_s20, 2  ;;  %s1228_s6 = scalar_lea.sflag [#allocation4], %s1227_s29 }
 0x2b1   : > { %p1493_p9 = pnand %p2435_p5, %p2434_p11 }
 0x2b3   : > { %1800 = dma.done.wait (!%p1493_p9), %s1228_s6, 6144  }
 0x2b4   : > { %1802 = vsyncadd (!%p1493_p9), %s1228_s6, 4294961152  ;;  %s22_s20 = sadd.s32 1, %s1825_s20   ;;  %s2436_s15 = smov %s1809_s16 }
 0x2b5   : > { %p19_p0 = scmp.ge.s32.totalorder %s22_s20, 4   ;;  %s2437_s16 = smov %s1813_s17 }
 0x2b6   : > { %s2438_s17 = smov %s2032_s10  ;;  %s2439_s18 = smov %s1821_s19 }
 0x2b7   : > { %s2440_s19 = smov %s2442_s1  ;;  %21 = sbr.rel (!%p19_p0) target bundleno = 10 (0xa), region = 93 }
 0x2be   :  { %1233 = vsyncpa [#allocation3], 1 }
 0x2bf   :  { %1235 = vsyncpa [#allocation3 + $0x1], 1 }
 0x2c0   :  { %1236 = vsyncpa [#allocation6], 1 }
 0x2c1   :  { %1237 = vsyncpa [#allocation9], 1 }
 0x2c2   :  { %1238 = vsyncpa [#allocation4], 1 }
 0x2c3   :  { %1240 = vsyncpa [#allocation4 + $0x1], 1 }

</bundles_post_ra>
